<compile_context>
chip_gen: v6e
topology: v6e:2x2x1
jax: 0.10.0
libtpu: 0.0.40
codegen_flags: <defaults>
</compile_context>

<pallas_src>
import jax
import jax.numpy as jnp
from jax import lax
from jax.experimental import pallas as pl
from jax.experimental.pallas import tpu as pltpu


def wav2vec2_attention(hidden_states, params, *, num_heads, head_dim):
    B, S, H = hidden_states.shape
    nh, hd = num_heads, head_dim
    A = nh * hd
    scaling = float(hd) ** (-0.5)
    cdt = hidden_states.dtype          # MXU compute dtype (bf16 in -> bf16 MXU)
    f32 = jnp.float32

    # ---- trace-time weight prep (zero in-kernel cost) ----------------------
    # Fused QKV weight with columns grouped per head as [q | k | v], so the
    # kernel can split heads with static lane slices at h == 0 and then only
    # needs dynamic leading-axis scratch indexing per head.
    wq = (params["wq"].astype(f32) * scaling).reshape(H, nh, hd)   # scaling folded in
    wk = params["wk"].astype(f32).reshape(H, nh, hd)
    wv = params["wv"].astype(f32).reshape(H, nh, hd)
    wqkv = jnp.stack([wq, wk, wv], axis=2).reshape(H, 3 * A).astype(cdt)

    bq = (params["bq"].astype(f32) * scaling).reshape(nh, hd)
    bk = params["bk"].astype(f32).reshape(nh, hd)
    bv = params["bv"].astype(f32).reshape(nh, hd)
    bqkv = jnp.stack([bq, bk, bv], axis=1).reshape(1, 3 * A)       # f32 bias

    wo = params["wo"].astype(cdt)                                  # (A, H); row order matches concat
    bo = params["bo"].astype(f32)                                  # (1, H)

    def kernel(x_ref, wqkv_ref, bqkv_ref, wo_ref, bo_ref, o_ref, qkv_ref, ctx_ref):
        h = pl.program_id(1)

        # Hoisted, lane-dense QKV projection: once per batch element.
        @pl.when(h == 0)
        def _():
            x = x_ref[0]                                           # (S, H), cdt
            fused = jnp.dot(x, wqkv_ref[...],
                            preferred_element_type=f32) + bqkv_ref[...]
            fused = fused.astype(cdt)                              # (S, 3A)
            for i in range(nh):                                    # static unroll; static lane slices
                qkv_ref[i] = fused[:, i * 3 * hd:(i + 1) * 3 * hd]

        # Per-head attention: only one (S, S) score tile live at a time.
        qkv_h = qkv_ref[h]                                         # (S, 3*hd)
        q = qkv_h[:, 0 * hd:1 * hd]                                # already scaled
        k = qkv_h[:, 1 * hd:2 * hd]
        v = qkv_h[:, 2 * hd:3 * hd]

        s = lax.dot_general(q, k, (((1,), (1,)), ((), ())),        # q @ k^T, no transpose
                            preferred_element_type=f32)            # (S, S) f32
        m = jnp.max(s, axis=-1, keepdims=True)
        p = jnp.exp(s - m)
        l = jnp.sum(p, axis=-1, keepdims=True)
        # dropout (eval mode) == identity; normalization deferred past P@V.
        ctx = jnp.dot(p.astype(cdt), v, preferred_element_type=f32)  # (S, hd) f32
        ctx_ref[h] = (ctx / l).astype(cdt)                         # exact normalize, tiny tensor

        # Single dense output projection after the last head (no per-head
        # (S, H) f32 accumulator read-modify-write).
        @pl.when(h == nh - 1)
        def _():
            ctx_all = jnp.concatenate([ctx_ref[i] for i in range(nh)], axis=-1)  # (S, A)
            out = jnp.dot(ctx_all, wo_ref[...],
                          preferred_element_type=f32) + bo_ref[...]
            o_ref[0] = out.astype(o_ref.dtype)

    def vmem_full():
        # Whole array resident in VMEM (constant across the grid -> copied once).
        return pl.BlockSpec(memory_space=pltpu.MemorySpace.VMEM)

    itemsize = jnp.dtype(cdt).itemsize
    resident = (
        H * 3 * A * itemsize + 3 * A * 4          # wqkv, bqkv
        + A * H * itemsize + H * 4                # wo, bo
        + 4 * S * H * itemsize                    # double-buffered x / out blocks
        + nh * S * 3 * hd * itemsize              # qkv scratch
        + nh * S * hd * itemsize                  # ctx scratch
        + 3 * S * S * 4                           # score / exp temporaries (f32)
        + 2 * S * 3 * A * 4                       # fused-projection temporaries
    )
    vmem_limit = int(min(max(resident * 3 // 2, 32 * 1024 * 1024), 64 * 1024 * 1024))

    return pl.pallas_call(
        kernel,
        out_shape=jax.ShapeDtypeStruct((B, S, H), hidden_states.dtype),
        grid_spec=pltpu.PrefetchScalarGridSpec(
            num_scalar_prefetch=0,
            grid=(B, nh),
            in_specs=[
                pl.BlockSpec((1, S, H), lambda b, h: (b, 0, 0)),   # hidden_states
                vmem_full(),                                       # wqkv
                vmem_full(),                                       # bqkv
                vmem_full(),                                       # wo
                vmem_full(),                                       # bo
            ],
            out_specs=pl.BlockSpec((1, S, H), lambda b, h: (b, 0, 0)),
            scratch_shapes=[
                pltpu.VMEM((nh, S, 3 * hd), cdt),                  # per-head [q|k|v]
                pltpu.VMEM((nh, S, hd), cdt),                      # per-head context
            ],
        ),
        compiler_params=pltpu.CompilerParams(
            dimension_semantics=("parallel", "arbitrary"),
            vmem_limit_bytes=vmem_limit),
    )(hidden_states, wqkv, bqkv, wo, bo)


def _reference(hidden_states, params, *, num_heads, head_dim):
    """Pure-JAX reference mirroring the PyTorch forward (mask=None, eval)."""
    B, S, H = hidden_states.shape
    A = num_heads * head_dim
    scaling = float(head_dim) ** (-0.5)
    x = hidden_states.astype(jnp.float32)
    q = x @ params["wq"] + params["bq"][0]
    k = x @ params["wk"] + params["bk"][0]
    v = x @ params["wv"] + params["bv"][0]
    q = q.reshape(B, S, num_heads, head_dim).transpose(0, 2, 1, 3)
    k = k.reshape(B, S, num_heads, head_dim).transpose(0, 2, 1, 3)
    v = v.reshape(B, S, num_heads, head_dim).transpose(0, 2, 1, 3)
    scores = jnp.einsum("bhqd,bhkd->bhqk", q, k) * scaling
    probs = jax.nn.softmax(scores, axis=-1)
    ctx = jnp.einsum("bhqk,bhkd->bhqd", probs, v)
    ctx = ctx.transpose(0, 2, 1, 3).reshape(B, S, A)
    return ctx @ params["wo"] + params["bo"][0]


if __name__ == "__main__":
    # Shapes implied by the module: head_dim = hidden_size // 12.
    batch = 2
    seq = 16
    hidden_size = 96          # -> head_dim = 8
    num_heads = 4             # -> all_head_size = 32
    head_dim = hidden_size // 12
    all_head_size = num_heads * head_dim

    key = jax.random.PRNGKey(0)
    kx, kq, kbq, kk, kbk, kv, kbv, ko, kbo = jax.random.split(key, 9)

    x = jax.random.normal(kx, (batch, seq, hidden_size), dtype=jnp.float32)

    def init_w(k, shape, fan_in):
        return jax.random.normal(k, shape, dtype=jnp.float32) / jnp.sqrt(fan_in)

    params = {
        "wq": init_w(kq, (hidden_size, all_head_size), hidden_size),
        "bq": init_w(kbq, (1, all_head_size), hidden_size),
        "wk": init_w(kk, (hidden_size, all_head_size), hidden_size),
        "bk": init_w(kbk, (1, all_head_size), hidden_size),
        "wv": init_w(kv, (hidden_size, all_head_size), hidden_size),
        "bv": init_w(kbv, (1, all_head_size), hidden_size),
        "wo": init_w(ko, (all_head_size, hidden_size), all_head_size),
        "bo": init_w(kbo, (1, hidden_size), all_head_size),
    }

    out = wav2vec2_attention(x, params, num_heads=num_heads, head_dim=head_dim)
    out = jax.block_until_ready(out)

    ref = _reference(x, params, num_heads=num_heads, head_dim=head_dim)
    assert out.shape == (batch, seq, hidden_size)
    assert jnp.allclose(out, ref, atol=2e-3, rtol=2e-3), "mismatch vs reference"

    print("KERNEL_OK")
</pallas_src>

<mosaic_0001>
module attributes {stable_mosaic.version = 11 : i64} {
  func.func @kernel(%arg0: i32, %arg1: i32, %arg2: memref<1x16x96xf32, #tpu.memory_space<vmem>>, %arg3: memref<96x96xf32, #tpu.memory_space<vmem>>, %arg4: memref<1x96xf32, #tpu.memory_space<vmem>>, %arg5: memref<32x96xf32, #tpu.memory_space<vmem>>, %arg6: memref<1x96xf32, #tpu.memory_space<vmem>>, %arg7: memref<1x16x96xf32, #tpu.memory_space<vmem>>, %arg8: memref<4x16x24xf32, #tpu.memory_space<vmem>>, %arg9: memref<4x16x8xf32, #tpu.memory_space<vmem>>) attributes {dimension_semantics = [#tpu.dimension_semantics<parallel>, #tpu.dimension_semantics<arbitrary>], iteration_bounds = array<i64: 2, 4>, scalar_prefetch = 0 : i64, scratch_operands = 2 : i64, tpu.core_type = #tpu.core_type<tc>, window_params = [{transform_indices = @transform_0, window_bounds = array<i64: 1, 16, 96>}, {pipeline_mode = #tpu.pipeline_mode<synchronous>, transform_indices = @transform_1, window_bounds = array<i64: 96, 96>}, {pipeline_mode = #tpu.pipeline_mode<synchronous>, transform_indices = @transform_2, window_bounds = array<i64: 1, 96>}, {pipeline_mode = #tpu.pipeline_mode<synchronous>, transform_indices = @transform_3, window_bounds = array<i64: 32, 96>}, {pipeline_mode = #tpu.pipeline_mode<synchronous>, transform_indices = @transform_4, window_bounds = array<i64: 1, 96>}, {transform_indices = @transform_5, window_bounds = array<i64: 1, 16, 96>}]} {
    %c0_i32 = arith.constant 0 : i32
    %0 = arith.cmpi eq, %arg1, %c0_i32 : i32
    %1 = arith.extui %0 : i1 to i32
    %c0_i32_0 = arith.constant 0 : i32
    %2 = arith.cmpi ne, %1, %c0_i32_0 : i32
    scf.if %2 {
      %c0_8 = arith.constant 0 : index
      %c0_9 = arith.constant 0 : index
      %c0_10 = arith.constant 0 : index
      %27 = vector.load %arg2[%c0_8, %c0_9, %c0_10] : memref<1x16x96xf32, #tpu.memory_space<vmem>>, vector<1x16x96xf32>
      %28 = vector.shape_cast %27 : vector<1x16x96xf32> to vector<16x96xf32>
      %c0_11 = arith.constant 0 : index
      %c0_12 = arith.constant 0 : index
      %29 = vector.load %arg3[%c0_11, %c0_12] : memref<96x96xf32, #tpu.memory_space<vmem>>, vector<96x96xf32>
      %cst_13 = arith.constant dense<0.000000e+00> : vector<16x96xf32>
      %30 = tpu.matmul %28, %29, %cst_13 {dimension_numbers = #tpu.dot_dimension_numbers<[1], [0], [0], [1], [0, 0, 1, 1], [], []>} : vector<16x96xf32>, vector<96x96xf32>, vector<16x96xf32> -> vector<16x96xf32>
      %c0_14 = arith.constant 0 : index
      %c0_15 = arith.constant 0 : index
      %31 = vector.load %arg4[%c0_14, %c0_15] : memref<1x96xf32, #tpu.memory_space<vmem>>, vector<1x96xf32>
      %32 = vector.broadcast %31 : vector<1x96xf32> to vector<16x96xf32>
      %33 = arith.addf %30, %32 : vector<16x96xf32>
      %34 = vector.extract_strided_slice %33 {offsets = [0, 0], sizes = [16, 24], strides = [1, 1]} : vector<16x96xf32> to vector<16x24xf32>
      %c0_16 = arith.constant 0 : index
      %c0_17 = arith.constant 0 : index
      %c0_18 = arith.constant 0 : index
      %35 = vector.load %arg8[%c0_16, %c0_17, %c0_18] : memref<4x16x24xf32, #tpu.memory_space<vmem>>, vector<1x16x24xf32>
      %36 = vector.shape_cast %35 : vector<1x16x24xf32> to vector<16x24xf32>
      %37 = vector.shape_cast %34 : vector<16x24xf32> to vector<1x16x24xf32>
      tpu.vector_store %arg8[%c0_16, %c0_17, %c0_18], %37 {strides = array<i32>} : memref<4x16x24xf32, #tpu.memory_space<vmem>>, vector<1x16x24xf32>,
      %38 = vector.extract_strided_slice %33 {offsets = [0, 24], sizes = [16, 24], strides = [1, 1]} : vector<16x96xf32> to vector<16x24xf32>
      %c1 = arith.constant 1 : index
      %c0_19 = arith.constant 0 : index
      %c0_20 = arith.constant 0 : index
      %39 = vector.load %arg8[%c1, %c0_19, %c0_20] : memref<4x16x24xf32, #tpu.memory_space<vmem>>, vector<1x16x24xf32>
      %40 = vector.shape_cast %39 : vector<1x16x24xf32> to vector<16x24xf32>
      %41 = vector.shape_cast %38 : vector<16x24xf32> to vector<1x16x24xf32>
      tpu.vector_store %arg8[%c1, %c0_19, %c0_20], %41 {strides = array<i32>} : memref<4x16x24xf32, #tpu.memory_space<vmem>>, vector<1x16x24xf32>,
      %42 = vector.extract_strided_slice %33 {offsets = [0, 48], sizes = [16, 24], strides = [1, 1]} : vector<16x96xf32> to vector<16x24xf32>
      %c2 = arith.constant 2 : index
      %c0_21 = arith.constant 0 : index
      %c0_22 = arith.constant 0 : index
      %43 = vector.load %arg8[%c2, %c0_21, %c0_22] : memref<4x16x24xf32, #tpu.memory_space<vmem>>, vector<1x16x24xf32>
      %44 = vector.shape_cast %43 : vector<1x16x24xf32> to vector<16x24xf32>
      %45 = vector.shape_cast %42 : vector<16x24xf32> to vector<1x16x24xf32>
      tpu.vector_store %arg8[%c2, %c0_21, %c0_22], %45 {strides = array<i32>} : memref<4x16x24xf32, #tpu.memory_space<vmem>>, vector<1x16x24xf32>,
      %46 = vector.extract_strided_slice %33 {offsets = [0, 72], sizes = [16, 24], strides = [1, 1]} : vector<16x96xf32> to vector<16x24xf32>
      %c3 = arith.constant 3 : index
      %c0_23 = arith.constant 0 : index
      %c0_24 = arith.constant 0 : index
      %47 = vector.load %arg8[%c3, %c0_23, %c0_24] : memref<4x16x24xf32, #tpu.memory_space<vmem>>, vector<1x16x24xf32>
      %48 = vector.shape_cast %47 : vector<1x16x24xf32> to vector<16x24xf32>
      %49 = vector.shape_cast %46 : vector<16x24xf32> to vector<1x16x24xf32>
      tpu.vector_store %arg8[%c3, %c0_23, %c0_24], %49 {strides = array<i32>} : memref<4x16x24xf32, #tpu.memory_space<vmem>>, vector<1x16x24xf32>,
    } else {
    }
    %3 = arith.index_cast %arg1 : i32 to index
    %c0 = arith.constant 0 : index
    %c0_1 = arith.constant 0 : index
    %4 = vector.load %arg8[%3, %c0, %c0_1] : memref<4x16x24xf32, #tpu.memory_space<vmem>>, vector<1x16x24xf32>
    %5 = vector.shape_cast %4 : vector<1x16x24xf32> to vector<16x24xf32>
    %6 = vector.extract_strided_slice %5 {offsets = [0, 0], sizes = [16, 8], strides = [1, 1]} : vector<16x24xf32> to vector<16x8xf32>
    %7 = vector.extract_strided_slice %5 {offsets = [0, 8], sizes = [16, 8], strides = [1, 1]} : vector<16x24xf32> to vector<16x8xf32>
    %8 = vector.extract_strided_slice %5 {offsets = [0, 16], sizes = [16, 8], strides = [1, 1]} : vector<16x24xf32> to vector<16x8xf32>
    %cst = arith.constant dense<0.000000e+00> : vector<16x16xf32>
    %9 = tpu.matmul %6, %7, %cst {dimension_numbers = #tpu.dot_dimension_numbers<[1], [1], [0], [0], [0, 0, 1, 0], [], []>} : vector<16x8xf32>, vector<16x8xf32>, vector<16x16xf32> -> vector<16x16xf32>
    %cst_2 = arith.constant dense<0xFF800000> : vector<16xf32>
    %10 = vector.multi_reduction <maximumf>, %9, %cst_2 [1] : vector<16x16xf32> to vector<16xf32>
    %11 = vector.shape_cast %10 : vector<16xf32> to vector<16x1xf32>
    %12 = vector.broadcast %11 : vector<16x1xf32> to vector<16x16xf32>
    %13 = arith.subf %9, %12 : vector<16x16xf32>
    %14 = math.exp %13 : vector<16x16xf32>
    %cst_3 = arith.constant dense<0.000000e+00> : vector<16xf32>
    %15 = vector.multi_reduction <add>, %14, %cst_3 [1] : vector<16x16xf32> to vector<16xf32>
    %16 = vector.shape_cast %15 : vector<16xf32> to vector<16x1xf32>
    %cst_4 = arith.constant dense<0.000000e+00> : vector<16x8xf32>
    %17 = tpu.matmul %14, %8, %cst_4 {dimension_numbers = #tpu.dot_dimension_numbers<[1], [0], [0], [1], [0, 0, 1, 1], [], []>} : vector<16x16xf32>, vector<16x8xf32>, vector<16x8xf32> -> vector<16x8xf32>
    %18 = vector.broadcast %16 : vector<16x1xf32> to vector<16x8xf32>
    %19 = arith.divf %17, %18 : vector<16x8xf32>
    %20 = arith.index_cast %arg1 : i32 to index
    %c0_5 = arith.constant 0 : index
    %c0_6 = arith.constant 0 : index
    %21 = vector.load %arg9[%20, %c0_5, %c0_6] : memref<4x16x8xf32, #tpu.memory_space<vmem>>, vector<1x16x8xf32>
    %22 = vector.shape_cast %21 : vector<1x16x8xf32> to vector<16x8xf32>
    %23 = vector.shape_cast %19 : vector<16x8xf32> to vector<1x16x8xf32>
    tpu.vector_store %arg9[%20, %c0_5, %c0_6], %23 {strides = array<i32>} : memref<4x16x8xf32, #tpu.memory_space<vmem>>, vector<1x16x8xf32>,
    %c3_i32 = arith.constant 3 : i32
    %24 = arith.cmpi eq, %arg1, %c3_i32 : i32
    %25 = arith.extui %24 : i1 to i32
    %c0_i32_7 = arith.constant 0 : i32
    %26 = arith.cmpi ne, %25, %c0_i32_7 : i32
    scf.if %26 {
      %c0_8 = arith.constant 0 : index
      %c0_9 = arith.constant 0 : index
      %c0_10 = arith.constant 0 : index
      %27 = vector.load %arg9[%c0_8, %c0_9, %c0_10] : memref<4x16x8xf32, #tpu.memory_space<vmem>>, vector<1x16x8xf32>
      %28 = vector.shape_cast %27 : vector<1x16x8xf32> to vector<16x8xf32>
      %c1 = arith.constant 1 : index
      %c0_11 = arith.constant 0 : index
      %c0_12 = arith.constant 0 : index
      %29 = vector.load %arg9[%c1, %c0_11, %c0_12] : memref<4x16x8xf32, #tpu.memory_space<vmem>>, vector<1x16x8xf32>
      %30 = vector.shape_cast %29 : vector<1x16x8xf32> to vector<16x8xf32>
      %c2 = arith.constant 2 : index
      %c0_13 = arith.constant 0 : index
      %c0_14 = arith.constant 0 : index
      %31 = vector.load %arg9[%c2, %c0_13, %c0_14] : memref<4x16x8xf32, #tpu.memory_space<vmem>>, vector<1x16x8xf32>
      %32 = vector.shape_cast %31 : vector<1x16x8xf32> to vector<16x8xf32>
      %c3 = arith.constant 3 : index
      %c0_15 = arith.constant 0 : index
      %c0_16 = arith.constant 0 : index
      %33 = vector.load %arg9[%c3, %c0_15, %c0_16] : memref<4x16x8xf32, #tpu.memory_space<vmem>>, vector<1x16x8xf32>
      %34 = vector.shape_cast %33 : vector<1x16x8xf32> to vector<16x8xf32>
      %35 = tpu.concatenate %28, %30, %32, %34 in 1 : vector<16x8xf32>, vector<16x8xf32>, vector<16x8xf32>, vector<16x8xf32> -> vector<16x32xf32>
      %c0_17 = arith.constant 0 : index
      %c0_18 = arith.constant 0 : index
      %36 = vector.load %arg5[%c0_17, %c0_18] : memref<32x96xf32, #tpu.memory_space<vmem>>, vector<32x96xf32>
      %cst_19 = arith.constant dense<0.000000e+00> : vector<16x96xf32>
      %37 = tpu.matmul %35, %36, %cst_19 {dimension_numbers = #tpu.dot_dimension_numbers<[1], [0], [0], [1], [0, 0, 1, 1], [], []>} : vector<16x32xf32>, vector<32x96xf32>, vector<16x96xf32> -> vector<16x96xf32>
      %c0_20 = arith.constant 0 : index
      %c0_21 = arith.constant 0 : index
      %38 = vector.load %arg6[%c0_20, %c0_21] : memref<1x96xf32, #tpu.memory_space<vmem>>, vector<1x96xf32>
      %39 = vector.broadcast %38 : vector<1x96xf32> to vector<16x96xf32>
      %40 = arith.addf %37, %39 : vector<16x96xf32>
      %c0_22 = arith.constant 0 : index
      %c0_23 = arith.constant 0 : index
      %c0_24 = arith.constant 0 : index
      %41 = vector.load %arg7[%c0_22, %c0_23, %c0_24] : memref<1x16x96xf32, #tpu.memory_space<vmem>>, vector<1x16x96xf32>
      %42 = vector.shape_cast %41 : vector<1x16x96xf32> to vector<16x96xf32>
      %43 = vector.shape_cast %40 : vector<16x96xf32> to vector<1x16x96xf32>
      tpu.vector_store %arg7[%c0_22, %c0_23, %c0_24], %43 {strides = array<i32>} : memref<1x16x96xf32, #tpu.memory_space<vmem>>, vector<1x16x96xf32>,
    } else {
    }
    return
  }
  func.func @transform_0(%arg0: i32, %arg1: i32) -> (i32, i32, i32) {
    %c0_i32 = arith.constant 0 : i32
    %c0_i32_0 = arith.constant 0 : i32
    %c0_i32_1 = arith.constant 0 : i32
    return %arg0, %c0_i32, %c0_i32_0 : i32, i32, i32
  }
  func.func @transform_1(%arg0: i32, %arg1: i32) -> (i32, i32) {
    %c0_i32 = arith.constant 0 : i32
    %c0_i32_0 = arith.constant 0 : i32
    %c0_i32_1 = arith.constant 0 : i32
    return %c0_i32, %c0_i32_0 : i32, i32
  }
  func.func @transform_2(%arg0: i32, %arg1: i32) -> (i32, i32) {
    %c0_i32 = arith.constant 0 : i32
    %c0_i32_0 = arith.constant 0 : i32
    %c0_i32_1 = arith.constant 0 : i32
    return %c0_i32, %c0_i32_0 : i32, i32
  }
  func.func @transform_3(%arg0: i32, %arg1: i32) -> (i32, i32) {
    %c0_i32 = arith.constant 0 : i32
    %c0_i32_0 = arith.constant 0 : i32
    %c0_i32_1 = arith.constant 0 : i32
    return %c0_i32, %c0_i32_0 : i32, i32
  }
  func.func @transform_4(%arg0: i32, %arg1: i32) -> (i32, i32) {
    %c0_i32 = arith.constant 0 : i32
    %c0_i32_0 = arith.constant 0 : i32
    %c0_i32_1 = arith.constant 0 : i32
    return %c0_i32, %c0_i32_0 : i32, i32
  }
  func.func @transform_5(%arg0: i32, %arg1: i32) -> (i32, i32, i32) {
    %c0_i32 = arith.constant 0 : i32
    %c0_i32_0 = arith.constant 0 : i32
    %c0_i32_1 = arith.constant 0 : i32
    return %arg0, %c0_i32, %c0_i32_0 : i32, i32, i32
  }
}

</mosaic_0001>

<bundles_post_ra>
// kernel: tpu_custom_call.1
= control target key start
LH: loop header
LB: loop body
LE: loop exit
PB: predicated region body
PF: predicated region fallthrough
CT: control target
= control target key end

     0   :  { %s1625_s0 = inlined_call_operand.hbm [shape: f32[2,16,96], index: 0, kind: input, shape index: {}]   ;;  %s1626_s1 = inlined_call_operand.hbm [shape: f32[96,96], index: 1, kind: input, shape index: {}]   ;;  %s1627_s2 = inlined_call_operand.vmem [shape: f32[1,96], index: 2, kind: input, shape index: {}]   ;;  %s1628_s3 = inlined_call_operand.hbm [shape: f32[32,96], index: 3, kind: input, shape index: {}]   ;;  %s1629_s4 = inlined_call_operand.vmem [shape: f32[1,96], index: 4, kind: input, shape index: {}]   ;;  %s1630_s5 = inlined_call_operand.hbm [shape: f32[2,16,96], index: 5, kind: output, shape index: {}]  }
   0x1   :  { %1635 = sst [smem:[#allocation17_spill]] %s1626_s1 }
   0x2   :  { %1636 = sst [smem:[#allocation18_spill]] %s1628_s3 }
   0x3   :  { %10 = vsyncpa [#allocation5], 0 }
   0x4   :  { %12 = vsyncpa [#allocation5 + $0x1], 0 }
   0x5   :  { %13 = vsyncpa [#allocation8], 0 }
   0x6   :  { %14 = vsyncpa [#allocation6], 0 }
   0x7   :  { %16 = vsyncpa [#allocation6 + $0x1], 0  ;;  %s1356_s18 = smov 0   ;;  %s1358_s19 = smov 0  }
   0x8   :  { %s1360_s20 = smov 0   ;;  %s1362_s21 = smov 0  }
   0x9   :  { %s1364_s22 = smov 0   ;;  %s1366_s23 = smov 0  }
   0xa   :  { %s1368_s24 = smov 0   ;;  %s1370_s25 = smov 0  }
   0xb LB: > { %1637 = sst [smem:[#allocation14_spill]] %s1300_s23  ;;  %s893_s26 = sadd.s32 4294967295, %s1308_s25   ;;  %s1308_s25 = sphi %s1370_s25, %s22_s25   ;;  %s1304_s24 = sphi %s1368_s24, %s1661_s24   ;;  %s1300_s23 = sphi %s1366_s23, %s1655_s23   ;;  %s1296_s22 = sphi %s1364_s22, %s1660_s22   ;;  %s1292_s21 = sphi %s1362_s21, %s1654_s21   ;;  %s1288_s20 = sphi %s1360_s20, %s1659_s20   ;;  %s1284_s19 = sphi %s1358_s19, %s1658_s19   ;;  %s1280_s18 = sphi %s1356_s18, %s1657_s18  }
   0xc   : > { %s894_s27 = sadd.s32 4294967294, %s1308_s25   ;;  %p54_p0 = scmp.ne.s32.totalorder %s1284_s19, %s1280_s18 }
   0xd   : > { %p1400_p1 = scmp.eq.s32.totalorder %s893_s26, 0  ;;  %p1404_p2 = scmp.eq.s32.totalorder %s893_s26, 7 }
   0xe   : > { %p168_p3 = scmp.eq.s32.totalorder %s894_s27, 7  ;;  %p895_p5 = scmp.ge.s32.totalorder %s1308_s25, 1 }
   0xf   : > { %p1410_p4 = por %p1400_p1, %p54_p0  ;;  %p175_p7 = scmp.lt.s32.totalorder %s1308_s25, 9 }
  0x10   : > { %p1415_p6 = por %p168_p3, %p54_p0  ;;  %s1310_s8 = smov [#allocation7]  }
  0x11   : > { %p1420_p8 = pnand %p895_p5, %p175_p7  ;;  %s187_s9 = sshll.u32 %s1310_s8, 4  ;;  %s188_s9 = int_to_ptr.vmem [resolvable:$true] %s187_s9 }
  0x12   : > { %s1641_s6 = scalar_select %p1415_p6, 1, 0 }
  0x13   : > { %p1021_p9 = pneg %p1420_p8  ;;  %s1311_s11 = smov [#allocation9]  }
  0x14   : > { %s203_s12 = sshll.u32 %s1311_s11, 4  ;;  %s1139_s13 = scalar_lea.vmem %s188_s9, 1536  ;;  %s204_s12 = int_to_ptr.vmem [resolvable:$true] %s203_s12 }
  0x15   : > { %p1428_p10 = pnand %p1021_p9, %p1400_p1  ;;  %p1140_p12 = scmp.ne.s32.totalorder %s188_s9, %s1139_s13 }
  0x16   : > { %p1147_p3 = scmp.lt.s32.totalorder %s188_s9, %s188_s9  ;;  %p1148_p5 = scmp.lt.s32.totalorder %s1139_s13, %s1139_s13 }
  0x17   : > { %p1130_p11 = pneg %p1428_p10 }
  0x18   : > { %p1149_p7 = por %p1148_p5, %p1147_p3 }
  0x19   : > { %p1142_p13 = pnand %p1140_p12, %p1130_p11 }
  0x1b   : > { %p1143_p0 = pneg %p1142_p13 }
  0x1d   : > { %p1150_p9 = pnand %p1149_p7, %p1143_p0 }
  0x1f   : > { %1153 = shalt.err (!%p1150_p9)
}
  0x20   : > { %s1631_s14 = smov 128   ;;  %s1632_s15 = smov 8  }
  0x21   : > { %s1644_s1 = sld [smem:[#allocation17_spill]]  ;;  %s1165_s26 = scalar_lea.vmem %s204_s12, 512 }
  0x22   : > { %p1166_p12 = scmp.ne.s32.totalorder %s204_s12, %s1165_s26  ;;  %p1173_p0 = scmp.lt.s32.totalorder %s204_s12, %s204_s12 }
  0x23   : > { %p1174_p5 = scmp.lt.s32.totalorder %s1165_s26, %s1165_s26 }
  0x24   : > { %p1168_p13 = pnand %p1166_p12, %p1130_p11 }
  0x25   : > { %p1175_p7 = por %p1174_p5, %p1173_p0 }
  0x26   : > { %p1169_p3 = pneg %p1168_p13 }
  0x27   : > { %1024 = dma.hbm_to_vmem [thread:$0]  (!%p1428_p10), %s1644_s1, 1536, %s188_s9, [#allocation8], %s1631_s14, %s1631_s14, %s1632_s15  }
  0x28   : > { %p1176_p9 = pnand %p1175_p7, %p1169_p3 }
  0x2a   : > { %1179 = shalt.err (!%p1176_p9)
}
  0x2b   : > { %s1645_s3 = sld [smem:[#allocation18_spill]]  ;;  %s31_s9 = sadd.s32 1, %s1300_s23 }
  0x2c   : > { %s34_s10 = sadd.s32 1, %s1304_s24  ;;  %p32_p11 = scmp.ge.s32.totalorder %s31_s9, 4 }
  0x2d   : > { %s41_s11 = sadd.s32 1, %s1288_s20  ;;  %p48_p12 = scmp.ne.s32.totalorder %s1288_s20, %s1284_s19 }
  0x2e   : > { %p49_p13 = scmp.eq.s32.totalorder %s1308_s25, 0  ;;  %s1663_s9 = smov (%p32_p11, %s31_s9), 0 }
  0x2f   : > { %1646 = sst [smem:[#allocation15_spill]] %s1663_s9  ;;  %s1665_s10 = smov (!%p32_p11, %s34_s10), %s1304_s24 }
  0x30   : > { %p1465_p3 = por %p49_p13, %p48_p12  ;;  %p1471_p0 = por %p1404_p2, %p48_p12 }
  0x31   : > { %1027 = dma.hbm_to_vmem [thread:$0]  (!%p1428_p10), %s1645_s3, 512, %s204_s12, [#allocation8], %s1631_s14, %s1631_s14, %s1632_s15  }
  0x32   : > { %p36_p10 = scmp.ge.s32.totalorder %s1665_s10, 2  ;;  %p1038_p5 = scmp.lt.s32.totalorder %s1308_s25, 8 }
  0x33   : > { %s220_s12 = sand.u32 1, %s1288_s20   ;;  %s927_s17 = sshll.u32 %s1304_s24, 8 }
  0x34   : > { %s1667_s10 = smov (%p36_p10, %s1665_s10), 0  ;;  %s899_s26 = sshll.u32 %s220_s12, 4 }
  0x35   : > { %1649 = sst [smem:[#allocation16_spill]] %s1667_s10  ;;  %s38_s27 = ssub.s32 %s1304_s24, %s1667_s10 }
  0x36   : > { %p39_p7 = scmp.eq.s32.totalorder %s38_s27, 0  ;;  %s230_s15 = scalar_lea.hbm %s1625_s0, %s927_s17 }
  0x37   : > { %s224_s29 = scalar_lea.vmem [#allocation4], %s899_s26  ;;  %p1487_p2 = pnand %p1038_p5, %p1465_p3 }
  0x38   : > { %s231_s1 = sshll.u32 %s224_s29, 4  ;;  %s221_s23 = scalar_lea.sflag [#allocation5], %s220_s12  ;;  %s232_s1 = int_to_ptr.vmem [resolvable:$true] %s231_s1 }
  0x39   : > { %s1492_s9 = scalar_select %p39_p7, %s1288_s20, %s41_s11  }
  0x3a   : > { %p1182_p9 = pneg %p1487_p2  ;;  %s1193_s10 = scalar_lea.vmem %s232_s1, 256 }
  0x3b   : > { %p1194_p11 = scmp.ne.s32.totalorder %s232_s1, %s1193_s10  ;;  %s1314_s14 = smov [#allocation4]  }
  0x3c   : > { %s1198_s17 = sshll.u32 %s1314_s14, 4  ;;  %s1199_s17 = int_to_ptr.vmem [resolvable:$false] %s1198_s17 }
  0x3d   : > { %p1196_p12 = pnand %p1194_p11, %p1182_p9  ;;  %s1200_s26 = scalar_lea.vmem %s1199_s17, 512 }
  0x3e   : > { %p1201_p10 = scmp.lt.s32.totalorder %s232_s1, %s1199_s17  ;;  %p1202_p3 = scmp.lt.s32.totalorder %s1200_s26, %s1193_s10 }
  0x3f   : > { %p1197_p13 = pneg %p1196_p12 }
  0x40   : > { %p1203_p5 = por %p1202_p3, %p1201_p10 }
  0x42   : > { %p1204_p6 = pnand %p1203_p5, %p1197_p13 }
  0x44   : > { %1207 = shalt.err (!%p1204_p6)
}
  0x45   : > { %s1651_s11 = smov 8   ;;  %s1652_s13 = smov 128  }
  0x46   : > { %1031 = dma.hbm_to_vmem [thread:$0]  (!%p1487_p2), %s230_s15, 256, %s232_s1, %s221_s23, %s1652_s13, %s1652_s13, %s1651_s11  }
  0x47   : > { %243 = sbr.rel (%p1420_p8) target bundleno = 1467 (0x5bb), region = 40  ;;  %s1504_s12 = sand.u32 (!%p1420_p8), 1, %s1284_s19  }
  0x48   : > { %s903_s27 = sshll.u32 (!%p1420_p8), %s1504_s12, 4  ;;  %s246_s10 = scalar_lea.sflag (!%p1420_p8), [#allocation5], %s1504_s12 }
  0x49   : > { %s1508_s8 = scalar_lea.vmem (!%p1420_p8), [#allocation4], %s903_s27 }
  0x4c   : > { %1267 = dma.done.wait (%p1410_p4), %s246_s10, 256  }
  0x4d   : > { %1269 = vsyncadd (%p1410_p4), %s246_s10, 4294967040 }
  0x4e   : > { %1271 = dma.done.wait (%p1400_p1), [#allocation8], 2048  }
  0x4f   : > { %1273 = vsyncadd (%p1400_p1), [#allocation8], 4294965248  ;;  %s1518_s1 = scalar_lea.vmem [#allocation10], %s903_s27  ;;  %p907_p6 = scmp.ne.s32.totalorder %s1292_s21, 0 }
  0x50   : > { %s1315_s28 = smov (!%p907_p6), 80   ;;  %s1316_s30 = smov (!%p907_p6), 104  }
  0x51   : > { %287 = sbr.rel (%p907_p6) target bundleno = 430 (0x1ae), region = 56  ;;  %s1317_s7 = smov (!%p907_p6), 56  }
  0x56   : > { %v301_v0 = vld [vmem:[#allocation7 + $0x58] sm:$0xff]  ;;  %v300_v1 = vld [vmem:[#allocation7 + $0x50] sm:$0xff]  ;;  %v299_v2 = vld [vmem:[#allocation7 + $0x48] sm:$0xff]  ;;  %vm309_vm0 = vcmask 785408   ;;  %vm391_vm1 = vcmask 195584  }
  0x57   : > { %957 = vmatprep.subr.mxu0 %v301_v0  ;;  %v298_v3 = vld [vmem:[#allocation7 + $0x40] sm:$0xff]  ;;  %v297_v5 = vld [vmem:[#allocation7 + $0x38] sm:$0xff]  ;;  %v296_v6 = vld [vmem:[#allocation7 + $0x30] sm:$0xff] }
  0x58   : > { %958 = vmatpush3.msra.mxu0 %v301_v0  ;;  %v288_v4 = vld [vmem:[%s1508_s8] sm:$0xff]  ;;  %v295_v7 = vld [vmem:[#allocation7 + $0x28] sm:$0xff]  ;;  %v293_v9 = vld [vmem:[#allocation7 + $0x18] sm:$0xff] }
  0x59   : > { %959 = vmatprep.subr.mxu0 %v300_v1  ;;  %981 = vmatprep.mubr.msk.f32.mxu0 %vm309_vm0, %v288_v4  ;;  %v294_v8 = vld [vmem:[#allocation7 + $0x20] sm:$0xff]  ;;  %v292_v10 = vld [vmem:[#allocation7 + $0x10] sm:$0xff]  ;;  %v291_v11 = vld [vmem:[#allocation7 + $0x8] sm:$0xff] }
  0x5a   : > { %960 = vmatpush3.msra.mxu0 %v300_v1  ;;  %v290_v12 = vld [vmem:[#allocation7] sm:$0xff]  ;;  %v289_v13 = vld [vmem:[%s1508_s8 + $0x8] sm:$0xff] }
  0x5b   : > { %961 = vmatprep.subr.mxu0 %v299_v2  ;;  %v908_v14 = vld [vmem:[%s1627_s2] ss:$0 sm:$0xff] }
  0x5c   : > { %962 = vmatpush3.msra.mxu0 %v299_v2 }
  0x5d   : > { %963 = vmatprep.subr.mxu0 %v298_v3 }
  0x5e   : > { %964 = vmatpush3.msra.mxu0 %v298_v3 }
  0x5f   : > { %965 = vmatprep.subr.mxu0 %v297_v5 }
  0x60   : > { %966 = vmatpush3.msra.mxu0 %v297_v5 }
  0x61   : > { %967 = vmatprep.subr.mxu0 %v296_v6 }
  0x62   : > { %968 = vmatpush3.msra.mxu0 %v296_v6 }
  0x63   : > { %969 = vmatprep.subr.mxu0 %v295_v7 }
  0x64   : > { %970 = vmatpush3.msra.mxu0 %v295_v7 }
  0x65   : > { %971 = vmatprep.subr.mxu0 %v294_v8 }
  0x66   : > { %972 = vmatpush3.msra.mxu0 %v294_v8 }
  0x67   : > { %973 = vmatprep.subr.mxu0 %v293_v9 }
  0x68   : > { %974 = vmatpush3.msra.mxu0 %v293_v9 }
  0x69   : > { %975 = vmatprep.subr.mxu0 %v292_v10 }
  0x6a   : > { %976 = vmatpush3.msra.mxu0 %v292_v10 }
  0x6b   : > { %977 = vmatprep.subr.mxu0 %v291_v11 }
  0x6c   : > { %978 = vmatpush3.msra.mxu0 %v291_v11 }
  0x6d   : > { %979 = vmatprep.subr.mxu0 %v290_v12 }
  0x6e   : > { %980 = vmatpush3.msra.mxu0 %v290_v12 }
  0x6f   : > { %982 = vmatmul.mubr.msk.f32.vlgmr.msra.gmra.mxu0 %vm309_vm0, %v289_v13 }
 0x12f   : > { %v983_v15 = vpop.f32.mrf.mxu0 }
 0x130   : > { %v388_v16 = vadd.f32 %v983_v15, %v908_v14 }
 0x131   : > { %v382_v17 = vpop.f32.mrf.mxu0 }
 0x132   : > { %393 = vst.msk [vmem:[#allocation2 + $0x8] sm:$0xff] %vm391_vm1, %v388_v16  ;;  %v383_v18 = vadd.f32 %v908_v14, %v382_v17  ;;  %407 = vrot.lane.b32.xlu1 %v388_v16, %s1315_s28  ;;  %398 = vrot.lane.b32.xlu0 %v388_v16, %s1316_s30 }
 0x134   : > { %392 = vst.msk [vmem:[#allocation2] sm:$0xff] %vm391_vm1, %v383_v18 }
 0x136   : > { %405 = vrot.lane.b32.xlu1 %v383_v18, %s1315_s28  ;;  %396 = vrot.lane.b32.xlu0 %v383_v18, %s1316_s30 }
 0x13a   : > { %416 = vrot.lane.b32.xlu1 %v388_v16, %s1317_s7  ;;  %414 = vrot.lane.b32.xlu0 %v383_v18, %s1317_s7 }
 0x1a4   : > { %v408_v19 = vpop.permute.xlu1 %407  ;;  %v399_v20 = vpop.permute.xlu0 %398 }
 0x1a5   : > { %413 = vst.msk [vmem:[#allocation2 + $0x28] sm:$0xff] %vm391_vm1, %v408_v19  ;;  %404 = vst.msk [vmem:[#allocation2 + $0x18] sm:$0xff] %vm391_vm1, %v399_v20 }
 0x1a8   : > { %v406_v21 = vpop.permute.xlu1 %405  ;;  %v397_v22 = vpop.permute.xlu0 %396 }
 0x1a9   : > { %412 = vst.msk [vmem:[#allocation2 + $0x20] sm:$0xff] %vm391_vm1, %v406_v21  ;;  %403 = vst.msk [vmem:[#allocation2 + $0x10] sm:$0xff] %vm391_vm1, %v397_v22 }
 0x1ac   : > { %v417_v23 = vpop.permute.xlu1 %416  ;;  %v415_v24 = vpop.permute.xlu0 %414 }
 0x1ad   : > { %422 = vst.msk [vmem:[#allocation2 + $0x38] sm:$0xff] %vm391_vm1, %v417_v23  ;;  %421 = vst.msk [vmem:[#allocation2 + $0x30] sm:$0xff] %vm391_vm1, %v415_v24 }
 0x1ae PF: > { %s911_s15 = sshll.u32 %s1292_s21, 4  ;;  %vm433_vm2 = vcmask 64512   ;;  %s1318_s14 = smov 120   ;;  %vm517_vm3 = vcmask 130048  }
 0x1af   : > { %s424_s29 = scalar_lea.vmem [#allocation2], %s911_s15  ;;  %s1319_s17 = smov 112  }
 0x1b0   : > { %s627_s26 = scalar_lea.vmem [#allocation3], %s911_s15  ;;  %p918_p1 = scmp.ne.s32.totalorder %s1292_s21, 3 }
 0x1b1   : > { %s1320_s11 = smov (!%p918_p1), 16   ;;  %s1321_s13 = smov (!%p918_p1), 8  }
 0x1b2   : > { %s1322_s21 = smov (!%p918_p1), 24  }
 0x1b4   : > { %v426_v25 = vld [vmem:[%s424_s29 + $0x8] sm:$0xff]  ;;  %v425_v26 = vld [vmem:[%s424_s29] sm:$0xff] }
 0x1b5   : > { %431 = vrot.lane.b32.xlu0 %v426_v25, %s1318_s14  ;;  %988 = vmatprep.mubr.msk.f32.mxu0 %vm433_vm2, %v425_v26 }
 0x1b9   : > { %429 = vrot.lane.b32.xlu0 %v425_v26, %s1318_s14 }
 0x1bd   : > { %538 = vrot.lane.b32.xlu0 %v426_v25, %s1319_s17 }
 0x227   : > { %v432_v27 = vpop.permute.xlu0 %431 }
 0x228   : > { %984 = vmatprep.subr.msk.mxu0 %vm433_vm2, %v432_v27 }
 0x229   : > { %985 = vmatpush3.xpose.msk.msra.mxu0 %vm433_vm2, %v432_v27 }
 0x22b   : > { %v430_v28 = vpop.permute.xlu0 %429 }
 0x22c   : > { %986 = vmatprep.subr.msk.mxu0 %vm433_vm2, %v430_v28 }
 0x22d   : > { %987 = vmatpush3.xpose.msk.msra.mxu0 %vm433_vm2, %v430_v28 }
 0x22f   : > { %v539_v33 = vpop.permute.xlu0 %538 }
 0x230   : > { %989 = vmatmul.mubr.msk.f32.vlgmr.msra.gmra.mxu0 %vm433_vm2, %v426_v25  ;;  %991 = vmatprep.subr.mxu1 %v539_v33 }
 0x231   : > { %992 = vmatpush3.msra.mxu1 %v539_v33 }
 0x2f0   : > { %v990_v29 = vpop.f32.mrf.mxu0 }
 0x2f1   : > { %v521_v30 = vsel %vm517_vm3, %v990_v29, -inf }
 0x2f2   : > { %522 = vmax.xlane.f32.xlu1 %v521_v30  ;;  %v508_v31 = vpop.f32.mrf.mxu0 }
 0x2f3   : > { %v518_v32 = vsel %vm517_vm3, %v508_v31, -inf }
 0x2f6   : > { %519 = vmax.xlane.f32.xlu1 %v518_v32 }
 0x307   : > { %536 = vrot.lane.b32.xlu1 %v425_v26, %s1319_s17 }
 0x37b   : > { %v523_v34 = vpop.xlane.xlu1 %522 }
 0x37c   : > { %v525_v35 = vsub.f32 %v990_v29, %v523_v34 }
 0x37e   : > { %v528_v36 = vmul.f32 1.442695, %v525_v35 }
 0x37f   : > { %v520_v37 = vpop.xlane.xlu1 %519 }
 0x380   : > { %1120 = vpow2.f32 %v528_v36  ;;  %v524_v38 = vsub.f32 %v508_v31, %v520_v37 }
 0x382   : > { %v526_v39 = vmul.f32 1.442695, %v524_v38 }
 0x383   : > { %v537_v40 = vpop.permute.xlu1 %536 }
 0x384   : > { %1122 = vpow2.f32 %v526_v39  ;;  %993 = vmatprep.subr.mxu1 %v537_v40 }
 0x385   : > { %994 = vmatpush3.msra.mxu1 %v537_v40 }
 0x38d   : > { %v1121_v41 = vpop.eup %1120 }
 0x38e   : > { %v533_v42 = vsel %vm517_vm3, %v1121_v41, 0.0 }
 0x38f   : > { %534 = vadd.xlane.f32.xlu1 %v533_v42 }
 0x391   : > { %v1123_v43 = vpop.eup %1122 }
 0x392   : > { %995 = vmatprep.mubr.msk.f32.mxu1 %vm517_vm3, %v1123_v43  ;;  %v530_v44 = vsel %vm517_vm3, %v1123_v43, 0.0 }
 0x393   : > { %531 = vadd.xlane.f32.xlu0 %v530_v44  ;;  %996 = vmatmul.mubr.msk.f32.vlgmr.msra.gmra.mxu1 %vm517_vm3, %v1121_v41 }
 0x418   : > { %v535_v45 = vpop.xlane.xlu1 %534 }
 0x419   : > { %1124 = vrcp.f32 %v535_v45 }
 0x41c   : > { %v532_v46 = vpop.xlane.xlu0 %531 }
 0x41d   : > { %1126 = vrcp.f32 %v532_v46 }
 0x426   : > { %v1125_v47 = vpop.eup %1124 }
 0x42a   : > { %v1127_v50 = vpop.eup %1126 }
 0x453   : > { %v997_v48 = vpop.f32.mrf.mxu1 }
 0x454   : > { %v626_v49 = vmul.f32 %v1125_v47, %v997_v48  ;;  %633 = sbr.rel (%p918_p1) target bundleno = 1443 (0x5a3), region = 60 }
 0x455   : > { %v614_v51 = vpop.f32.mrf.mxu1 }
 0x456   : > { %629 = vst.msk [vmem:[%s627_s26 + $0x8] sm:$0xff] %vm433_vm2, %v626_v49  ;;  %v624_v52 = vmul.f32 %v1127_v50, %v614_v51 }
 0x458   : > { %628 = vst.msk [vmem:[%s627_s26] sm:$0xff] %vm433_vm2, %v624_v52 }
 0x459   : > { %v679_v57 = vld [vmem:[#allocation9 + $0x18] sm:$0xff]  ;;  %v678_v58 = vld [vmem:[#allocation9 + $0x10] sm:$0xff]  ;;  %v677_v59 = vld [vmem:[#allocation9 + $0x8] sm:$0xff]  ;;  %vm673_vm4 = vcmask 195584   ;;  %vm687_vm5 = vcmask 261120   ;;  %vm769_vm6 = vcmask 785408  }
 0x45a   : > { %998 = vmatprep.subr.mxu0 %v679_v57  ;;  %v676_v62 = vld [vmem:[#allocation9] sm:$0xff] }
 0x45b   : > { %999 = vmatpush3.msra.mxu0 %v679_v57  ;;  %v919_v13 = vld [vmem:[%s1629_s4] ss:$0 sm:$0xff] }
 0x45c   : > { %1000 = vmatprep.subr.mxu0 %v678_v58 }
 0x45d   : > { %1001 = vmatpush3.msra.mxu0 %v678_v58 }
 0x45e   : > { %1002 = vmatprep.subr.mxu0 %v677_v59 }
 0x45f   : > { %v640_v53 = vld [vmem:[#allocation3 + $0x20] sm:$0xff]  ;;  %v637_v54 = vld [vmem:[#allocation3 + $0x10] sm:$0xff]  ;;  %v641_v55 = vld [vmem:[#allocation3 + $0x28] sm:$0xff]  ;;  %1003 = vmatpush3.msra.mxu0 %v677_v59 }
 0x460   : > { %655 = vrot.lane.b32.xlu1 %v640_v53, %s1320_s11  ;;  %647 = vrot.lane.b32.xlu0 %v637_v54, %s1321_s13  ;;  %v638_v56 = vld [vmem:[#allocation3 + $0x18] sm:$0xff]  ;;  %v643_v61 = vld [vmem:[#allocation3 + $0x30] sm:$0xff]  ;;  %v634_v1 = vld [vmem:[#allocation3] sm:$0xff] }
 0x461   : > { %v644_v60 = vld [vmem:[#allocation3 + $0x38] sm:$0xff]  ;;  %1004 = vmatprep.subr.mxu0 %v676_v62  ;;  %v635_v2 = vld [vmem:[#allocation3 + $0x8] sm:$0xff] }
 0x462   : > { %1005 = vmatpush3.msra.mxu0 %v676_v62 }
 0x464   : > { %657 = vrot.lane.b32.xlu1 %v641_v55, %s1320_s11  ;;  %649 = vrot.lane.b32.xlu0 %v638_v56, %s1321_s13 }
 0x468   : > { %665 = vrot.lane.b32.xlu1 %v644_v60, %s1322_s21  ;;  %663 = vrot.lane.b32.xlu0 %v643_v61, %s1322_s21 }
 0x4d2   : > { %v656_v63 = vpop.permute.xlu1 %655  ;;  %v648_v0 = vpop.permute.xlu0 %647 }
 0x4d3   : > { %v669_v5 = vsel %vm433_vm2, %v634_v1, %v648_v0 }
 0x4d4   : > { %v671_v7 = vsel %vm517_vm3, %v669_v5, %v656_v63 }
 0x4d6   : > { %v658_v3 = vpop.permute.xlu1 %657  ;;  %v650_v4 = vpop.permute.xlu0 %649 }
 0x4d7   : > { %v670_v6 = vsel %vm433_vm2, %v635_v2, %v650_v4 }
 0x4d8   : > { %v672_v8 = vsel %vm517_vm3, %v670_v6, %v658_v3 }
 0x4da   : > { %v666_v9 = vpop.permute.xlu1 %665  ;;  %v664_v10 = vpop.permute.xlu0 %663 }
 0x4db   : > { %v675_v11 = vsel %vm673_vm4, %v672_v8, %v666_v9  ;;  %v674_v12 = vsel %vm673_vm4, %v671_v7, %v664_v10 }
 0x4dc   : > { %1006 = vmatprep.mubr.msk.f32.mxu0 %vm687_vm5, %v674_v12 }
 0x4dd   : > { %1007 = vmatmul.mubr.msk.f32.vlgmr.msra.gmra.mxu0 %vm687_vm5, %v675_v11 }
 0x59d   : > { %v1008_v14 = vpop.f32.mrf.mxu0 }
 0x59e   : > { %v766_v15 = vadd.f32 %v1008_v14, %v919_v13 }
 0x59f   : > { %v760_v16 = vpop.f32.mrf.mxu0 }
 0x5a0   : > { %771 = vst.msk [vmem:[%s1518_s1 + $0x8] sm:$0xff] %vm769_vm6, %v766_v15  ;;  %v761_v17 = vadd.f32 %v919_v13, %v760_v16 }
 0x5a2   : > { %770 = vst.msk [vmem:[%s1518_s1] sm:$0xff] %vm769_vm6, %v761_v17 }
 0x5a3 PF: > { %s928_s8 = sshll.u32 %s1296_s22, 8  ;;  %s786_s30 = sshll.u32 %s1518_s1, 4  ;;  %s1572_s30 = int_to_ptr.vmem [resolvable:$true] %s786_s30 }
 0x5a4   : > { %s1569_s28 = scalar_lea.hbm %s1630_s5, %s928_s8  ;;  %s773_s7 = scalar_lea.sflag [#allocation6], %s1504_s12 }
 0x5a5   : > { %s1208_s15 = scalar_lea.vmem %s1572_s30, 256  ;;  %s1323_s29 = smov [#allocation10]  }
 0x5a6   : > { %p1209_p4 = scmp.ne.s32.totalorder %s1572_s30, %s1208_s15  ;;  %s1212_s14 = sshll.u32 %s1323_s29, 4  ;;  %s1213_s14 = int_to_ptr.vmem [resolvable:$false] %s1212_s14 }
 0x5a7   : > { %s1214_s22 = scalar_lea.vmem %s1213_s14, 512  ;;  %p1215_p2 = scmp.lt.s32.totalorder %s1572_s30, %s1213_s14 }
 0x5a8   : > { %p1210_p8 = pnand %p1209_p4, %p1471_p0  ;;  %p1216_p9 = scmp.lt.s32.totalorder %s1214_s22, %s1208_s15 }
 0x5aa   : > { %p1211_p7 = pneg %p1210_p8  ;;  %p1217_p11 = por %p1216_p9, %p1215_p2 }
 0x5ac   : > { %p1218_p12 = pnand %p1217_p11, %p1211_p7 }
 0x5ae   : > { %1221 = shalt.err (!%p1218_p12)
}
 0x5af   : > { %s1222_s1 = scalar_lea.hbm %s1569_s28, 256  ;;  %s1226_s11 = scalar_lea.hbm %s1630_s5, 512 }
 0x5b0   : > { %p1223_p13 = scmp.ne.s32.totalorder %s1569_s28, %s1222_s1  ;;  %p1227_p5 = scmp.lt.s32.totalorder %s1569_s28, %s1630_s5 }
 0x5b1   : > { %p1228_p6 = scmp.lt.s32.totalorder %s1226_s11, %s1222_s1 }
 0x5b2   : > { %p1224_p10 = pnand %p1223_p13, %p1471_p0 }
 0x5b3   : > { %p1229_p1 = por %p1228_p6, %p1227_p5 }
 0x5b4   : > { %p1225_p3 = pneg %p1224_p10 }
 0x5b6   : > { %p1230_p4 = pnand %p1229_p1, %p1225_p3 }
 0x5b8   : > { %1233 = shalt.err (!%p1230_p4)
}
 0x5b9   : > { %s1324_s27 = smov 128   ;;  %s1325_s10 = smov 8  }
 0x5ba   : > { %1019 = dma.vmem_to_hbm [thread:$0]  (%p1471_p0), %s1572_s30, 256, %s1569_s28, %s773_s7, %s1324_s27, %s1324_s27, %s1325_s10  }
 0x5bb PF: > { %p1041_p8 = scmp.ge.s32.totalorder %s1308_s25, 2  ;;  %s801_s8 = sand.u32 1, %s1280_s18  }
 0x5bc   : > { %p1653_p7 = scmp.ne.s32.totalorder %s1641_s6, 0  ;;  %s802_s3 = scalar_lea.sflag [#allocation6], %s801_s8 }
 0x5be   : > { %p1033_p2 = pnand %p1041_p8, %p1653_p7 }
 0x5c0   : > { %p1034_p9 = pneg %p1033_p2 }
 0x5c2   : > { %1275 = dma.done.wait (%p1034_p9), %s802_s3, 256  }
 0x5c3   : > { %1277 = vsyncadd (%p1034_p9), %s802_s3, 4294967040  ;;  %s22_s25 = sadd.s32 1, %s1308_s25   ;;  %s1654_s21 = sld [smem:[#allocation14_spill]] }
 0x5c4   : > { %p19_p11 = scmp.ge.s32.totalorder %s22_s25, 10   ;;  %s1655_s23 = sld [smem:[#allocation15_spill]] }
 0x5c5   : > { %s1656_s16 = sld [smem:[#allocation16_spill]]  ;;  %s1657_s18 = smov %s1284_s19 }
 0x5c6   : > { %s1658_s19 = smov %s1288_s20  ;;  %s1659_s20 = smov %s1492_s9 }
 0x5c7   : > { %s1660_s22 = smov %s1304_s24  ;;  %21 = sbr.rel (!%p19_p11) target bundleno = 11 (0xb), region = 109 }
 0x5cb   : > { %s1661_s24 = smov %s1656_s16 }
 0x5cc   :  { %807 = vsyncpa [#allocation5], 1 }
 0x5cd   :  { %809 = vsyncpa [#allocation5 + $0x1], 1 }
 0x5ce   :  { %810 = vsyncpa [#allocation8], 1 }
 0x5cf   :  { %811 = vsyncpa [#allocation6], 1 }
 0x5d0   :  { %813 = vsyncpa [#allocation6 + $0x1], 1 }

</bundles_post_ra>
